<compile_context>
chip_gen: v6e
topology: v6e:2x2x1
jax: 0.10.0
libtpu: 0.0.40
codegen_flags: <defaults>
</compile_context>

<pallas_src>
import jax
import jax.numpy as jnp
from jax.experimental import pallas as pl
from jax.experimental.pallas import tpu as pltpu

LANES = 128
MAX_TILE_ROWS = 2048            # 2048 rows x 128 lanes x 4 B = 1 MiB per channel per step
TARGET_BLOCK_BYTES = 1 << 20    # aim for ~1 MiB of input per grid step (DMA efficiency)


def conv1x1_tanh_kernel(x_ref, w_ref, b_ref, o_ref):
    # x_ref: VMEM (nb, C, tile_r, 128)
    # w_ref: SMEM (C,)   b_ref: SMEM (1,)
    # o_ref: VMEM (nb, 1, tile_r, 128)
    C = x_ref.shape[1]
    # Bias folded into the accumulator init; static unroll over channels (C=3):
    # pure VPU scalar-FMA work, tanh goes to the EUP slot.
    acc = x_ref[:, 0, :, :] * w_ref[0] + b_ref[0]
    for c in range(1, C):
        acc = acc + x_ref[:, c, :, :] * w_ref[c]
    o_ref[:, 0, :, :] = jnp.tanh(acc).astype(o_ref.dtype)


def _round_up(a, b):
    return ((a + b - 1) // b) * b


@jax.jit
def conv2d_tanh_forward(x, weight, bias):
    """x: (N, C, H, W); weight: (1, C, 1, 1); bias: (1,). Returns (N, 1, H, W)."""
    N, C, H, W = x.shape
    O = weight.shape[0]
    assert O == 1 and weight.shape[1] == C, "kernel specialized for Conv2d(C->1, 1x1)"

    L = H * W
    L_pad = _round_up(L, LANES)
    R = L_pad // LANES                       # rows of the (R, 128) slab per (n, c)

    x_flat = x.reshape(N, C, L)              # free reshape, no NCHW->CNHW transpose
    if L_pad != L:
        # Only taken when H*W is not a multiple of 128 (not the case here).
        # TODO(synk): fold the ragged lane tail into the kernel to avoid this extra HBM pass.
        x_flat = jnp.pad(x_flat, ((0, 0), (0, 0), (0, L_pad - L)))
    x_slab = x_flat.reshape(N, C, R, LANES)

    # --- Row-tile selection (big tiles; partial last tile is masked by Pallas) ---
    tile_r = min(R, MAX_TILE_ROWS)
    if N == 1 and tile_r == R and R >= 16:
        # Single image: split rows so both v7x TensorCores get a parallel step.
        tile_r = _round_up(pl.cdiv(R, 2), 8)
    r_steps = pl.cdiv(R, tile_r)

    # --- Small-image batching: pack several N per block so each DMA is ~1 MiB ---
    itemsize = jnp.dtype(x.dtype).itemsize
    per_item_bytes = C * tile_r * LANES * itemsize
    nb = 1
    if r_steps == 1 and per_item_bytes < TARGET_BLOCK_BYTES:
        nb = min(N, max(1, TARGET_BLOCK_BYTES // per_item_bytes))
        if N >= 2:                           # keep >= 2 parallel grid programs (megacore)
            nb = min(nb, max(1, N // 2))
    n_steps = pl.cdiv(N, nb)

    w_vec = weight.reshape(C).astype(jnp.float32)   # scalar weights via SMEM
    b_vec = bias.reshape(1).astype(jnp.float32)

    out = pl.pallas_call(
        conv1x1_tanh_kernel,
        out_shape=jax.ShapeDtypeStruct((N, 1, R, LANES), x.dtype),
        grid=(n_steps, r_steps),
        in_specs=[
            pl.BlockSpec((nb, C, tile_r, LANES), lambda n, r: (n, 0, r, 0)),
            pl.BlockSpec(memory_space=pltpu.MemorySpace.SMEM),
            pl.BlockSpec(memory_space=pltpu.MemorySpace.SMEM),
        ],
        out_specs=pl.BlockSpec((nb, 1, tile_r, LANES), lambda n, r: (n, 0, r, 0)),
        compiler_params=pltpu.CompilerParams(
            dimension_semantics=("parallel", "parallel")),
    )(x_slab, w_vec, b_vec)

    out = out.reshape(N, 1, L_pad)
    if L_pad != L:                            # no-op (elided) when H*W is lane-aligned
        out = out[:, :, :L]
    return out.reshape(N, O, H, W)


if __name__ == "__main__":
    key = jax.random.PRNGKey(0)
    kx, kw, kb = jax.random.split(key, 3)

    N, C, H, W = 2, 3, 16, 16
    x = jax.random.normal(kx, (N, C, H, W), dtype=jnp.float32)

    # Deterministic Conv2d(3, 1, kernel_size=1) parameter init
    # (uniform in [-1/sqrt(fan_in), 1/sqrt(fan_in)], fan_in = 3*1*1)
    bound = 1.0 / jnp.sqrt(3.0)
    weight = jax.random.uniform(kw, (1, C, 1, 1), jnp.float32, -bound, bound)
    bias = jax.random.uniform(kb, (1,), jnp.float32, -bound, bound)

    out = conv2d_tanh_forward(x, weight, bias)
    out = jax.block_until_ready(out)

    # Reference check (plain JAX)
    ref = jnp.tanh(
        jnp.einsum("nchw,oc->nohw", x, weight.reshape(1, C)) + bias.reshape(1, 1, 1, 1)
    )
    assert out.shape == (N, 1, H, W)
    assert jnp.allclose(out, ref, atol=1e-5, rtol=1e-5)

    print("KERNEL_OK")
</pallas_src>

<mosaic_0001>
module attributes {stable_mosaic.version = 11 : i64} {
  func.func @conv1x1_tanh_kernel(%arg0: i32, %arg1: i32, %arg2: memref<1x3x2x128xf32, #tpu.memory_space<vmem>>, %arg3: memref<3xf32, #tpu.memory_space<smem>>, %arg4: memref<1xf32, #tpu.memory_space<smem>>, %arg5: memref<1x1x2x128xf32, #tpu.memory_space<vmem>>) attributes {dimension_semantics = [#tpu.dimension_semantics<parallel>, #tpu.dimension_semantics<parallel>], iteration_bounds = array<i64: 2, 1>, scalar_prefetch = 0 : i64, scratch_operands = 0 : i64, tpu.core_type = #tpu.core_type<tc>, window_params = [{transform_indices = @transform_0, window_bounds = array<i64: 1, 3, 2, 128>}, {transform_indices = @transform_1, window_bounds = array<i64: 3>}, {transform_indices = @transform_2, window_bounds = array<i64: 1>}, {transform_indices = @transform_3, window_bounds = array<i64: 1, 1, 2, 128>}]} {
    %c0 = arith.constant 0 : index
    %c0_0 = arith.constant 0 : index
    %c0_1 = arith.constant 0 : index
    %c0_2 = arith.constant 0 : index
    %0 = vector.load %arg2[%c0, %c0_0, %c0_1, %c0_2] : memref<1x3x2x128xf32, #tpu.memory_space<vmem>>, vector<1x1x2x128xf32>
    %1 = vector.shape_cast %0 : vector<1x1x2x128xf32> to vector<1x2x128xf32>
    %c0_3 = arith.constant 0 : index
    %2 = memref.load %arg3[%c0_3] : memref<3xf32, #tpu.memory_space<smem>>
    %3 = vector.broadcast %2 : f32 to vector<1x2x128xf32>
    %4 = arith.mulf %1, %3 : vector<1x2x128xf32>
    %c0_4 = arith.constant 0 : index
    %5 = memref.load %arg4[%c0_4] : memref<1xf32, #tpu.memory_space<smem>>
    %6 = vector.broadcast %5 : f32 to vector<1x2x128xf32>
    %7 = arith.addf %4, %6 : vector<1x2x128xf32>
    %c0_5 = arith.constant 0 : index
    %c1 = arith.constant 1 : index
    %c0_6 = arith.constant 0 : index
    %c0_7 = arith.constant 0 : index
    %8 = vector.load %arg2[%c0_5, %c1, %c0_6, %c0_7] : memref<1x3x2x128xf32, #tpu.memory_space<vmem>>, vector<1x1x2x128xf32>
    %9 = vector.shape_cast %8 : vector<1x1x2x128xf32> to vector<1x2x128xf32>
    %c1_8 = arith.constant 1 : index
    %10 = memref.load %arg3[%c1_8] : memref<3xf32, #tpu.memory_space<smem>>
    %11 = vector.broadcast %10 : f32 to vector<1x2x128xf32>
    %12 = arith.mulf %9, %11 : vector<1x2x128xf32>
    %13 = arith.addf %7, %12 : vector<1x2x128xf32>
    %c0_9 = arith.constant 0 : index
    %c2 = arith.constant 2 : index
    %c0_10 = arith.constant 0 : index
    %c0_11 = arith.constant 0 : index
    %14 = vector.load %arg2[%c0_9, %c2, %c0_10, %c0_11] : memref<1x3x2x128xf32, #tpu.memory_space<vmem>>, vector<1x1x2x128xf32>
    %15 = vector.shape_cast %14 : vector<1x1x2x128xf32> to vector<1x2x128xf32>
    %c2_12 = arith.constant 2 : index
    %16 = memref.load %arg3[%c2_12] : memref<3xf32, #tpu.memory_space<smem>>
    %17 = vector.broadcast %16 : f32 to vector<1x2x128xf32>
    %18 = arith.mulf %15, %17 : vector<1x2x128xf32>
    %19 = arith.addf %13, %18 : vector<1x2x128xf32>
    %20 = math.tanh %19 : vector<1x2x128xf32>
    %c0_13 = arith.constant 0 : index
    %c0_14 = arith.constant 0 : index
    %c0_15 = arith.constant 0 : index
    %c0_16 = arith.constant 0 : index
    %21 = vector.load %arg5[%c0_13, %c0_14, %c0_15, %c0_16] : memref<1x1x2x128xf32, #tpu.memory_space<vmem>>, vector<1x1x2x128xf32>
    %22 = vector.shape_cast %21 : vector<1x1x2x128xf32> to vector<1x2x128xf32>
    %23 = vector.shape_cast %20 : vector<1x2x128xf32> to vector<1x1x2x128xf32>
    tpu.vector_store %arg5[%c0_13, %c0_14, %c0_15, %c0_16], %23 {strides = array<i32>} : memref<1x1x2x128xf32, #tpu.memory_space<vmem>>, vector<1x1x2x128xf32>,
    return
  }
  func.func @transform_0(%arg0: i32, %arg1: i32) -> (i32, i32, i32, i32) {
    %c0_i32 = arith.constant 0 : i32
    %c0_i32_0 = arith.constant 0 : i32
    %c0_i32_1 = arith.constant 0 : i32
    return %arg0, %c0_i32, %arg1, %c0_i32_0 : i32, i32, i32, i32
  }
  func.func @transform_1(%arg0: i32, %arg1: i32) -> i32 {
    %c0_i32 = arith.constant 0 : i32
    %c0_i32_0 = arith.constant 0 : i32
    return %c0_i32 : i32
  }
  func.func @transform_2(%arg0: i32, %arg1: i32) -> i32 {
    %c0_i32 = arith.constant 0 : i32
    %c0_i32_0 = arith.constant 0 : i32
    return %c0_i32 : i32
  }
  func.func @transform_3(%arg0: i32, %arg1: i32) -> (i32, i32, i32, i32) {
    %c0_i32 = arith.constant 0 : i32
    %c0_i32_0 = arith.constant 0 : i32
    %c0_i32_1 = arith.constant 0 : i32
    return %arg0, %c0_i32, %arg1, %c0_i32_0 : i32, i32, i32, i32
  }
}

</mosaic_0001>

<bundles_post_ra>
// kernel: conv2d_tanh_forward.1
= control target key start
LH: loop header
LB: loop body
LE: loop exit
PB: predicated region body
PF: predicated region fallthrough
CT: control target
= control target key end

     0   :  { %s505_s0 = inlined_call_operand.vmem [shape: f32[2,3,2,128], index: 0, kind: input, shape index: {}]   ;;  %s506_s1 = inlined_call_operand.vmem [shape: f32[3], index: 1, kind: input, shape index: {}]   ;;  %s507_s2 = inlined_call_operand.<no memory space> [shape: f32[1], index: 2, kind: input, shape index: {}]   ;;  %s508_s3 = inlined_call_operand.vmem [shape: f32[2,1,2,128], index: 3, kind: output, shape index: {}]  }
   0x1   :  { %8 = sst [smem:[#allocation2]] %s507_s2 }
   0x2   :  { %9 = vsyncpa [#allocation4], 0  ;;  %s446_s14 = smov 0   ;;  %s448_s15 = smov 0  }
   0x3   :  { %s450_s16 = smov 0  }
   0x4 LB: > { %s326_s2 = sadd.s32 4294967295, %s420_s16   ;;  %s27_s17 = sadd.s32 1, %s416_s15  ;;  %s420_s16 = sphi %s450_s16, %s15_s16   ;;  %s416_s15 = sphi %s448_s15, %s512_s15   ;;  %s412_s14 = sphi %s446_s14, %s511_s14  }
   0x5   : > { %p29_p0 = scmp.ge.s32.totalorder %s27_s17, 2  ;;  %p328_p1 = scmp.ge.s32.totalorder %s420_s16, 1 }
   0x6   : > { %p130_p2 = scmp.lt.s32.totalorder %s420_s16, 3  ;;  %p471_p4 = scmp.eq.s32.totalorder %s326_s2, 0 }
   0x7   : > { %s514_s17 = smov (%p29_p0, %s27_s17), 0  ;;  %s143_s22 = sshll.u32 %s506_s1, 4  ;;  %s144_s22 = int_to_ptr.vmem [resolvable:$true] %s143_s22 }
   0x8   : > { %p467_p3 = pnand %p328_p1, %p130_p2  ;;  %s379_s23 = scalar_lea.vmem %s144_s22, 16 }
   0x9   : > { %p380_p7 = scmp.ne.s32.totalorder %s144_s22, %s379_s23  ;;  %p387_p11 = scmp.lt.s32.totalorder %s144_s22, %s144_s22 }
   0xa   : > { %p346_p5 = pneg %p467_p3  ;;  %p388_p12 = scmp.lt.s32.totalorder %s379_s23, %s379_s23 }
   0xc   : > { %p347_p6 = pnand %p471_p4, %p346_p5  ;;  %p389_p13 = por %p388_p12, %p387_p11 }
   0xe   : > { %p381_p8 = pneg %p347_p6 }
  0x10   : > { %p382_p9 = pnand %p381_p8, %p380_p7 }
  0x12   : > { %p383_p10 = pneg %p382_p9 }
  0x14   : > { %p390_p0 = pnand %p389_p13, %p383_p10 }
  0x16   : > { %393 = shalt.err (!%p390_p0)
}
  0x17   : > { %s422_s24 = smov [#allocation3]   ;;  %170 = sbr.rel (%p467_p3) target bundleno = 61 (0x3d), region = 32 }
  0x18   : > { %349 = dma.vmem_to_smem (!%p347_p6), %s144_s22, 16, %s422_s24, [#allocation4]  }
  0x1c   : > { %407 = dma.done.wait (%p471_p4), [#allocation4], 16  }
  0x1d   : > { %409 = vsyncadd (%p471_p4), [#allocation4], 4294967280 }
  0x1e   : > { %176 = sfence }
  0x1f   : > { %p200_p1 = scmp.lt.s32.totalorder %s412_s14, 1  ;;  %s216_s25 = sld [smem:[#allocation3]] }
  0x20   : > { %s219_s26 = sld [smem:[#allocation2]] }
  0x21   : > { %s516_s14 = smov (!%p200_p1, %s412_s14), 1  ;;  %s336_s27 = sld [smem:[#allocation3 + $0x1]] }
  0x22   : > { %s341_s28 = smul.u32 6, %s516_s14  ;;  %s338_s29 = sld [smem:[#allocation3 + $0x2]] }
  0x23   : > { %s334_s6 = sshll.u32 %s516_s14, 1 }
  0x24   : > { %s207_s5 = scalar_lea.vmem %s505_s0, %s341_s28  ;;  %s214_s9 = scalar_lea.vmem %s508_s3, %s334_s6 }
  0x25   : > { %v217_v0 = vstv %s216_s25  ;;  %v215_v1 = vld [vmem:[%s207_s5] sm:$0x3]  ;;  %v335_v3 = vld [vmem:[%s207_s5 + $0x2] sm:$0x3]  ;;  %v337_v6 = vld [vmem:[%s207_s5 + $0x4] sm:$0x3] }
  0x26   : > { %v220_v2 = vstv %s219_s26  ;;  %v218_v4 = vmul.f32 %v217_v0, %v215_v1 }
  0x27   : > { %v225_v5 = vstv %s336_s27 }
  0x28   : > { %v221_v7 = vadd.f32 %v220_v2, %v218_v4  ;;  %v226_v8 = vmul.f32 %v335_v3, %v225_v5  ;;  %v231_v9 = vstv %s338_s29 }
  0x29   : > { %v232_v11 = vmul.f32 %v337_v6, %v231_v9 }
  0x2a   : > { %v227_v10 = vadd.f32 %v226_v8, %v221_v7 }
  0x2c   : > { %v233_v12 = vadd.f32 %v232_v11, %v227_v10 }
  0x2e   : > { %377 = vtanh.f32 %v233_v12 }
  0x3b   : > { %v378_v13 = vpop.eup %377 }
  0x3c   : > { %235 = vst [vmem:[%s214_s9] sm:$0x3] %v378_v13 }
  0x3d PF: > { %s15_s16 = sadd.s32 1, %s420_s16   ;;  %s511_s14 = smov %s416_s15 }
  0x3e   : > { %p12_p2 = scmp.ge.s32.totalorder %s15_s16, 4   ;;  %s512_s15 = smov %s514_s17 }
  0x40   :  { %14 = sbr.rel (!%p12_p2) target bundleno = 4 (0x4), region = 69 }
  0x45   :  { %261 = vsyncpa [#allocation4], 1 }
  0x46   :  { %263 = vsyncpa [#allocation4 + $0x1], 1 }

</bundles_post_ra>
